<compile_context>
chip_gen: v6e
topology: v6e:2x2x1
jax: 0.10.0
libtpu: 0.0.40
codegen_flags: <defaults>
</compile_context>

<pallas_src>
import jax
import jax.numpy as jnp
from jax.experimental import pallas as pl
from jax.experimental.pallas import tpu as pltpu

_LANES = 512          # lane-dense width, multiple of 128
_BLOCK_ROWS = 512     # 512 x 512 f32 = 1 MiB per tile per buffer
_SMALL_FASTPATH = 1024  # below this many elements, skip the Pallas launch


def _sigmoid_kernel(x_ref, o_ref):
    x = x_ref[...]
    half = jnp.asarray(0.5, dtype=x.dtype)
    one = jnp.asarray(1.0, dtype=x.dtype)
    # sigmoid(x) = 0.5 * (tanh(0.5 * x) + 1): one EUP transcendental (tanh),
    # the rest is cheap VPU mul/add (vs. exp followed by a divide).
    o_ref[...] = (half * (jnp.tanh(half * x) + one)).astype(o_ref.dtype)


def sigmoid_pallas(x: jax.Array) -> jax.Array:
    total = x.size
    if total == 0:
        return x
    if total < _SMALL_FASTPATH:
        # Launch + per-step overhead dwarfs the work at toy sizes.
        return jax.nn.sigmoid(x)

    orig_shape = x.shape
    orig_dtype = x.dtype

    # Lane-dense 2D slab: (rows, _LANES), padded so rows * _LANES >= total.
    flat = x.reshape(-1)
    rows = pl.cdiv(total, _LANES)
    padded = rows * _LANES
    if padded != total:
        flat = jnp.pad(flat, (0, padded - total))
    x2d = flat.reshape(rows, _LANES)

    # Block rows: either the full row extent (small inputs; no (8,128)
    # constraint when block == full dim) or 512 (divisible by 8).
    block_rows = rows if rows <= _BLOCK_ROWS else _BLOCK_ROWS
    grid = (pl.cdiv(rows, block_rows),)

    out2d = pl.pallas_call(
        _sigmoid_kernel,
        out_shape=jax.ShapeDtypeStruct(x2d.shape, orig_dtype),
        grid_spec=pl.GridSpec(
            grid=grid,
            in_specs=[pl.BlockSpec((block_rows, _LANES), lambda i: (i, 0))],
            out_specs=pl.BlockSpec((block_rows, _LANES), lambda i: (i, 0)),
        ),
        compiler_params=pltpu.CompilerParams(
            dimension_semantics=("parallel",),
        ),
    )(x2d)

    return out2d.reshape(-1)[:total].reshape(orig_shape)


class M:
    """JAX mirror of the PyTorch module: forward(input) = sigmoid(input).

    (The PyTorch module also constructs an nn.ReLU but never uses it in
    forward, so only Sigmoid is implemented.)
    """

    def __call__(self, x):
        return sigmoid_pallas(x)


if __name__ == "__main__":
    key = jax.random.PRNGKey(0)
    m = M()

    # Main demo input: small NCHW tensor large enough to exercise the Pallas
    # kernel path (2*4*16*16 = 2048 elements).
    x = jax.random.normal(key, (2, 4, 16, 16), dtype=jnp.float32)
    out = jax.block_until_ready(m(x))
    ref = jax.nn.sigmoid(x)
    assert out.shape == x.shape and out.dtype == x.dtype
    assert jnp.allclose(out, ref, atol=1e-5, rtol=1e-5), "mismatch vs reference sigmoid"

    # Tiny tutorial-style input (reshaped to (-1, 1, 2, 2)) — takes the
    # small-input fast path but must still match the reference.
    x_tiny = jax.random.normal(jax.random.PRNGKey(1), (8,), dtype=jnp.float32)
    x_tiny = jnp.reshape(x_tiny, (-1, 1, 2, 2))
    out_tiny = jax.block_until_ready(m(x_tiny))
    assert jnp.allclose(out_tiny, jax.nn.sigmoid(x_tiny), atol=1e-6), "tiny-input mismatch"

    print("KERNEL_OK")
</pallas_src>

<mosaic_0001>
module attributes {stable_mosaic.version = 11 : i64} {
  func.func @_sigmoid_kernel(%arg0: i32, %arg1: memref<4x512xf32, #tpu.memory_space<vmem>>, %arg2: memref<4x512xf32, #tpu.memory_space<vmem>>) attributes {dimension_semantics = [#tpu.dimension_semantics<parallel>], iteration_bounds = array<i64: 1>, scalar_prefetch = 0 : i64, scratch_operands = 0 : i64, tpu.core_type = #tpu.core_type<tc>, window_params = [{transform_indices = @transform_0, window_bounds = array<i64: 4, 512>}, {transform_indices = @transform_1, window_bounds = array<i64: 4, 512>}]} {
    %c0 = arith.constant 0 : index
    %c0_0 = arith.constant 0 : index
    %0 = vector.load %arg1[%c0, %c0_0] : memref<4x512xf32, #tpu.memory_space<vmem>>, vector<4x512xf32>
    %cst = arith.constant 5.000000e-01 : f32
    %1 = vector.broadcast %cst : f32 to vector<4x512xf32>
    %2 = arith.mulf %1, %0 : vector<4x512xf32>
    %3 = math.tanh %2 : vector<4x512xf32>
    %cst_1 = arith.constant 1.000000e+00 : f32
    %4 = vector.broadcast %cst_1 : f32 to vector<4x512xf32>
    %5 = arith.addf %3, %4 : vector<4x512xf32>
    %cst_2 = arith.constant 5.000000e-01 : f32
    %6 = vector.broadcast %cst_2 : f32 to vector<4x512xf32>
    %7 = arith.mulf %6, %5 : vector<4x512xf32>
    %c0_3 = arith.constant 0 : index
    %c0_4 = arith.constant 0 : index
    %8 = vector.load %arg2[%c0_3, %c0_4] : memref<4x512xf32, #tpu.memory_space<vmem>>, vector<4x512xf32>
    tpu.vector_store %arg2[%c0_3, %c0_4], %7 {strides = array<i32>} : memref<4x512xf32, #tpu.memory_space<vmem>>, vector<4x512xf32>,
    return
  }
  func.func @transform_0(%arg0: i32) -> (i32, i32) {
    %c0_i32 = arith.constant 0 : i32
    %c0_i32_0 = arith.constant 0 : i32
    return %arg0, %c0_i32 : i32, i32
  }
  func.func @transform_1(%arg0: i32) -> (i32, i32) {
    %c0_i32 = arith.constant 0 : i32
    %c0_i32_0 = arith.constant 0 : i32
    return %arg0, %c0_i32 : i32, i32
  }
}

</mosaic_0001>

<bundles_post_ra>
// kernel: tpu_custom_call.1
= control target key start
LH: loop header
LB: loop body
LE: loop exit
PB: predicated region body
PF: predicated region fallthrough
CT: control target
= control target key end

     0   :  { %6 = vsyncpa [#allocation3], 0  ;;  %s116_s0 = inlined_call_operand.hbm [shape: f32[4,512], index: 0, kind: input, shape index: {}]   ;;  %s117_s1 = inlined_call_operand.hbm [shape: f32[4,512], index: 1, kind: output, shape index: {}]  }
   0x1   :  { %7 = vsyncpa [#allocation4], 0  ;;  %s98_s6 = smov [#allocation2]  }
   0x2   :  { %s14_s7 = sshll.u32 %s98_s6, 4  ;;  %s15_s7 = int_to_ptr.vmem [resolvable:$true] %s14_s7 }
   0x3   :  { %s62_s8 = scalar_lea.vmem %s15_s7, 256  ;;  %p67_p1 = scmp.lt.s32.totalorder %s15_s7, %s15_s7 }
   0x4   :  { %p63_p0 = scmp.ne.s32.totalorder %s15_s7, %s62_s8  ;;  %p68_p2 = scmp.lt.s32.totalorder %s62_s8, %s62_s8 }
   0x6   :  { %p69_p3 = por %p68_p2, %p67_p1 }
   0x8   :  { %p70_p4 = pnand %p69_p3, %p63_p0 }
   0xa   :  { %73 = shalt.err (!%p70_p4)
}
   0xb   :  { %17 = dma.hbm_to_vmem [thread:$0]  %s116_s0, 256, %s15_s7, [#allocation3]  }
   0xc   :  { %94 = dma.done.wait [#allocation3], 256  }
   0xd   :  { %95 = vsyncadd [#allocation3], 4294967040  ;;  %v21_v0 = vld [vmem:[#allocation2] sm:$0xff]  ;;  %v22_v1 = vld [vmem:[#allocation2 + $0x8] sm:$0xff]  ;;  %s99_s11 = smov [#allocation5]  }
   0xe   :  { %v23_v2 = vmul.f32 0.5, %v21_v0  ;;  %v24_v3 = vmul.f32 0.5, %v22_v1  ;;  %s39_s12 = sshll.u32 %s99_s11, 4  ;;  %s40_s12 = int_to_ptr.vmem [resolvable:$true] %s39_s12 }
   0xf   :  { %s74_s0 = scalar_lea.vmem %s40_s12, 256  ;;  %p79_p6 = scmp.lt.s32.totalorder %s40_s12, %s40_s12 }
  0x10   :  { %50 = vtanh.f32 %v23_v2  ;;  %p75_p5 = scmp.ne.s32.totalorder %s40_s12, %s74_s0  ;;  %p80_p7 = scmp.lt.s32.totalorder %s74_s0, %s74_s0 }
  0x11   :  { %52 = vtanh.f32 %v24_v3 }
  0x12   :  { %p81_p8 = por %p80_p7, %p79_p6 }
  0x14   :  { %p82_p9 = pnand %p81_p8, %p75_p5 }
  0x1d   :  { %v51_v4 = vpop.eup %50 }
  0x1e   :  { %v53_v5 = vpop.eup %52  ;;  %v27_v6 = vadd.f32 1.0, %v51_v4 }
  0x1f   :  { %v28_v7 = vadd.f32 1.0, %v53_v5 }
  0x20   :  { %v29_v8 = vmul.f32 0.5, %v27_v6 }
  0x21   :  { %v30_v9 = vmul.f32 0.5, %v28_v7 }
  0x22   :  { %31 = vst [vmem:[#allocation5] sm:$0xff] %v29_v8 }
  0x23   :  { %32 = vst [vmem:[#allocation5 + $0x8] sm:$0xff] %v30_v9 }
  0x24   :  { %85 = shalt.err (!%p82_p9)
}
  0x25   :  { %42 = dma.vmem_to_hbm [thread:$0]  %s40_s12, 256, %s117_s1, [#allocation4]  }
  0x26   :  { %96 = dma.done.wait [#allocation4], 256  }
  0x27   :  { %97 = vsyncadd [#allocation4], 4294967040 }
  0x28   :  { %46 = vsyncpa [#allocation3], 1 }
  0x29   :  { %47 = vsyncpa [#allocation4], 1 }

</bundles_post_ra>
